<compile_context>
chip_gen: v5e
topology: v5e:2x2
jax: 0.10.0
libtpu: 0.0.40
codegen_flags: <defaults>
</compile_context>

<pallas_src>
import functools

import jax
import jax.numpy as jnp
from jax.experimental import pallas as pl
from jax.experimental.pallas import tpu as pltpu


# ---------------------------------------------------------------------------
# Fused kernel: all Linear(+ReLU) layers, final Linear, log_softmax.
# ---------------------------------------------------------------------------
def _fused_mlp_kernel(*refs, num_layers: int, n_classes: int):
    # refs layout:
    #   inputs : x, (w0, b0), (w1, b1), ..., (w_{L-1}, b_{L-1})
    #   outputs: act0, act1, ..., act_{L-1} (final one = logits), log_probs
    x_ref = refs[0]
    wb_refs = refs[1 : 1 + 2 * num_layers]
    out_refs = refs[1 + 2 * num_layers :]
    act_refs = out_refs[:num_layers]
    logp_ref = out_refs[num_layers]

    h = x_ref[...].astype(jnp.float32)
    for i in range(num_layers):
        w = wb_refs[2 * i][...]                      # bf16 (In_p, Out_p)
        b = wb_refs[2 * i + 1][...]                  # f32  (1, Out_p)
        # bf16 MXU operands, f32 accumulation; element-wise math stays f32.
        y = jnp.dot(h.astype(jnp.bfloat16), w,
                    preferred_element_type=jnp.float32) + b
        if i < num_layers - 1:
            y = jnp.maximum(y, 0.0)
        act_refs[i][...] = y.astype(act_refs[i].dtype)
        h = y

    # Row-wise log_softmax over the real class columns only; padded columns
    # (zero weight / zero bias) are masked to a large negative value so they
    # contribute exp(.) == 0 and never win the row max.
    col = jax.lax.broadcasted_iota(jnp.int32, h.shape, 1)
    logits = jnp.where(col < n_classes, h, jnp.float32(-1e30))
    m = jnp.max(logits, axis=-1, keepdims=True)
    z = logits - m
    lse = jnp.log(jnp.sum(jnp.exp(z), axis=-1, keepdims=True))
    logp_ref[...] = (z - lse).astype(logp_ref.dtype)


# ---------------------------------------------------------------------------
# One-time setup: pad parameters, build a jitted forward closure.
# ---------------------------------------------------------------------------
def _round_up(n: int, m: int) -> int:
    return ((n + m - 1) // m) * m


def build_linear_model(params, batch_size: int):
    """params: list of (W (In, Out), b (Out,)) per surrogate Linear layer.

    Pads parameters ONCE (weights stored bf16, biases f32) and returns a
    jitted forward(x_nchw) -> (log_probs (B, n_classes), [activations]).
    """
    num_layers = len(params)
    in0 = params[0][0].shape[0]
    n_classes = params[-1][0].shape[1]
    dims = [in0] + [w.shape[1] for (w, _) in params]
    dims_p = [_round_up(d, 128) for d in dims]

    # Batch tiling: one tile at small batch; 128-row tiles (parallel grid axis,
    # lights up both v7x TensorCores) once the batch is non-trivial.
    B = batch_size
    if B >= 128:
        TM = 128
        Bp = _round_up(B, TM)
    else:
        TM = _round_up(B, 8)
        Bp = TM
    n_tiles = Bp // TM

    # --- pad parameters once (hoisted out of the per-call path) -------------
    padded_wb = []
    for i, (w, b) in enumerate(params):
        wp = jnp.zeros((dims_p[i], dims_p[i + 1]), jnp.bfloat16)
        wp = wp.at[: w.shape[0], : w.shape[1]].set(w.astype(jnp.bfloat16))
        bp = jnp.zeros((1, dims_p[i + 1]), jnp.float32)
        bp = bp.at[0, : b.shape[0]].set(b.astype(jnp.float32))
        padded_wb.extend([wp, bp])

    kernel = functools.partial(
        _fused_mlp_kernel, num_layers=num_layers, n_classes=n_classes
    )

    # --- BlockSpecs ----------------------------------------------------------
    in_specs = [pl.BlockSpec((TM, dims_p[0]), lambda i: (i, 0))]
    for li in range(num_layers):
        in_specs.append(
            pl.BlockSpec((dims_p[li], dims_p[li + 1]), lambda i: (0, 0)))  # W
        in_specs.append(
            pl.BlockSpec((1, dims_p[li + 1]), lambda i: (0, 0)))           # b

    out_shape = tuple(
        jax.ShapeDtypeStruct((Bp, dims_p[li + 1]), jnp.float32)
        for li in range(num_layers)
    ) + (jax.ShapeDtypeStruct((Bp, dims_p[-1]), jnp.float32),)
    out_specs = tuple(
        pl.BlockSpec((TM, dims_p[li + 1]), lambda i: (i, 0))
        for li in range(num_layers)
    ) + (pl.BlockSpec((TM, dims_p[-1]), lambda i: (i, 0)),)

    # --- VMEM limit derived from actual padded buffer sizes -----------------
    in_bytes = TM * dims_p[0] * 4                              # x tile (f32)
    in_bytes += sum(dims_p[i] * dims_p[i + 1] * 2 for i in range(num_layers))  # W bf16
    in_bytes += sum(8 * dims_p[i + 1] * 4 for i in range(num_layers))          # b (8-sublane pad)
    out_bytes = sum(TM * dims_p[i + 1] * 4 for i in range(num_layers))
    out_bytes += TM * dims_p[-1] * 4
    vmem_bytes = 2 * (in_bytes + out_bytes) + (2 << 20)        # double-buffer + headroom
    vmem_limit = min(max(vmem_bytes, 8 << 20), 64 << 20)       # legal on v7x too

    fused_call = pl.pallas_call(
        kernel,
        out_shape=out_shape,
        grid=(n_tiles,),
        in_specs=in_specs,
        out_specs=out_specs,
        compiler_params=pltpu.CompilerParams(
            dimension_semantics=("parallel",),
            vmem_limit_bytes=vmem_limit,
        ),
    )

    @jax.jit
    def forward(x_nchw):
        x = x_nchw.reshape(x_nchw.shape[0], -1).astype(jnp.float32)  # flatten(1)
        xp = jnp.zeros((Bp, dims_p[0]), jnp.float32).at[:B, :in0].set(x)
        outs = fused_call(xp, *padded_wb)
        layer_output = [outs[li][:B, : dims[li + 1]] for li in range(num_layers)]
        log_probs = outs[num_layers][:B, :n_classes]
        return log_probs, layer_output

    return forward


# ---------------------------------------------------------------------------
# Deterministic parameter construction + plain-JAX reference + run
# ---------------------------------------------------------------------------
def make_params(key, dims):
    """dims = [in0, out0=in1, out1=in2, ...]; returns [(W (In,Out), b (Out,)), ...]."""
    params = []
    for i in range(len(dims) - 1):
        kin, kout = dims[i], dims[i + 1]
        key, kw, kb = jax.random.split(key, 3)
        bound = 1.0 / jnp.sqrt(kin)
        w = jax.random.uniform(kw, (kin, kout), jnp.float32, -bound, bound)
        b = jax.random.uniform(kb, (kout,), jnp.float32, -bound, bound)
        params.append((w, b))
    return params


def reference_forward(x_nchw, params):
    x = x_nchw.reshape(x_nchw.shape[0], -1)
    outs = []
    for (w, b) in params[:-1]:
        x = jnp.maximum(x @ w + b, 0.0)
        outs.append(x)
    w, b = params[-1]
    x = x @ w + b
    outs.append(x)
    return jax.nn.log_softmax(x, axis=1), outs


if __name__ == "__main__":
    key = jax.random.PRNGKey(0)
    k_x, k_p = jax.random.split(key)

    # Small shapes: batch=2, channels=4, spatial=8x8 -> 256 flattened features.
    # Surrogate MLP dims (as linearModel would build from a conv net):
    # 256 -> 128 -> 64 -> 10
    x = jax.random.normal(k_x, (2, 4, 8, 8), jnp.float32)
    params = make_params(k_p, [4 * 8 * 8, 128, 64, 10])

    forward = build_linear_model(params, batch_size=x.shape[0])
    logp, layer_out = forward(x)
    jax.block_until_ready(logp)
    for t in layer_out:
        jax.block_until_ready(t)

    # correctness check against plain-JAX f32 reference; tolerance loosened
    # because the kernel uses bf16 MXU operands (f32 accumulation).
    ref_logp, ref_out = reference_forward(x, params)
    assert jnp.allclose(logp, ref_logp, atol=5e-2, rtol=5e-2)
    for a, b in zip(layer_out, ref_out):
        assert jnp.allclose(a, b, atol=5e-2, rtol=5e-2)

    print("KERNEL_OK")
</pallas_src>

<mosaic_0001>
module attributes {stable_mosaic.version = 11 : i64} {
  func.func @_fused_mlp_kernel(%arg0: i32, %arg1: memref<8x256xf32, #tpu.memory_space<vmem>>, %arg2: memref<256x128xbf16, #tpu.memory_space<vmem>>, %arg3: memref<1x128xf32, #tpu.memory_space<vmem>>, %arg4: memref<128x128xbf16, #tpu.memory_space<vmem>>, %arg5: memref<1x128xf32, #tpu.memory_space<vmem>>, %arg6: memref<128x128xbf16, #tpu.memory_space<vmem>>, %arg7: memref<1x128xf32, #tpu.memory_space<vmem>>, %arg8: memref<8x128xf32, #tpu.memory_space<vmem>>, %arg9: memref<8x128xf32, #tpu.memory_space<vmem>>, %arg10: memref<8x128xf32, #tpu.memory_space<vmem>>, %arg11: memref<8x128xf32, #tpu.memory_space<vmem>>) attributes {dimension_semantics = [#tpu.dimension_semantics<parallel>], iteration_bounds = array<i64: 1>, scalar_prefetch = 0 : i64, scratch_operands = 0 : i64, tpu.core_type = #tpu.core_type<tc>, window_params = [{transform_indices = @transform_0, window_bounds = array<i64: 8, 256>}, {pipeline_mode = #tpu.pipeline_mode<synchronous>, transform_indices = @transform_1, window_bounds = array<i64: 256, 128>}, {pipeline_mode = #tpu.pipeline_mode<synchronous>, transform_indices = @transform_2, window_bounds = array<i64: 1, 128>}, {pipeline_mode = #tpu.pipeline_mode<synchronous>, transform_indices = @transform_3, window_bounds = array<i64: 128, 128>}, {pipeline_mode = #tpu.pipeline_mode<synchronous>, transform_indices = @transform_4, window_bounds = array<i64: 1, 128>}, {pipeline_mode = #tpu.pipeline_mode<synchronous>, transform_indices = @transform_5, window_bounds = array<i64: 128, 128>}, {pipeline_mode = #tpu.pipeline_mode<synchronous>, transform_indices = @transform_6, window_bounds = array<i64: 1, 128>}, {transform_indices = @transform_7, window_bounds = array<i64: 8, 128>}, {transform_indices = @transform_8, window_bounds = array<i64: 8, 128>}, {transform_indices = @transform_9, window_bounds = array<i64: 8, 128>}, {transform_indices = @transform_10, window_bounds = array<i64: 8, 128>}]} {
    %c0 = arith.constant 0 : index
    %c0_0 = arith.constant 0 : index
    %0 = vector.load %arg1[%c0, %c0_0] : memref<8x256xf32, #tpu.memory_space<vmem>>, vector<8x256xf32>
    %c0_1 = arith.constant 0 : index
    %c0_2 = arith.constant 0 : index
    %1 = vector.load %arg2[%c0_1, %c0_2] : memref<256x128xbf16, #tpu.memory_space<vmem>>, vector<256x128xbf16>
    %c0_3 = arith.constant 0 : index
    %c0_4 = arith.constant 0 : index
    %2 = vector.load %arg3[%c0_3, %c0_4] : memref<1x128xf32, #tpu.memory_space<vmem>>, vector<1x128xf32>
    %3 = arith.truncf %0 : vector<8x256xf32> to vector<8x256xbf16>
    %cst = arith.constant dense<0.000000e+00> : vector<8x128xf32>
    %4 = tpu.matmul %3, %1, %cst {dimension_numbers = #tpu.dot_dimension_numbers<[1], [0], [0], [1], [0, 0, 1, 1], [], []>} : vector<8x256xbf16>, vector<256x128xbf16>, vector<8x128xf32> -> vector<8x128xf32>
    %5 = vector.broadcast %2 : vector<1x128xf32> to vector<8x128xf32>
    %6 = arith.addf %4, %5 : vector<8x128xf32>
    %cst_5 = arith.constant 0.000000e+00 : f32
    %7 = vector.broadcast %cst_5 : f32 to vector<8x128xf32>
    %8 = arith.maximumf %6, %7 : vector<8x128xf32>
    %c0_6 = arith.constant 0 : index
    %c0_7 = arith.constant 0 : index
    %9 = vector.load %arg8[%c0_6, %c0_7] : memref<8x128xf32, #tpu.memory_space<vmem>>, vector<8x128xf32>
    tpu.vector_store %arg8[%c0_6, %c0_7], %8 {strides = array<i32>} : memref<8x128xf32, #tpu.memory_space<vmem>>, vector<8x128xf32>,
    %c0_8 = arith.constant 0 : index
    %c0_9 = arith.constant 0 : index
    %10 = vector.load %arg4[%c0_8, %c0_9] : memref<128x128xbf16, #tpu.memory_space<vmem>>, vector<128x128xbf16>
    %c0_10 = arith.constant 0 : index
    %c0_11 = arith.constant 0 : index
    %11 = vector.load %arg5[%c0_10, %c0_11] : memref<1x128xf32, #tpu.memory_space<vmem>>, vector<1x128xf32>
    %12 = arith.truncf %8 : vector<8x128xf32> to vector<8x128xbf16>
    %cst_12 = arith.constant dense<0.000000e+00> : vector<8x128xf32>
    %13 = tpu.matmul %12, %10, %cst_12 {dimension_numbers = #tpu.dot_dimension_numbers<[1], [0], [0], [1], [0, 0, 1, 1], [], []>} : vector<8x128xbf16>, vector<128x128xbf16>, vector<8x128xf32> -> vector<8x128xf32>
    %14 = vector.broadcast %11 : vector<1x128xf32> to vector<8x128xf32>
    %15 = arith.addf %13, %14 : vector<8x128xf32>
    %cst_13 = arith.constant 0.000000e+00 : f32
    %16 = vector.broadcast %cst_13 : f32 to vector<8x128xf32>
    %17 = arith.maximumf %15, %16 : vector<8x128xf32>
    %c0_14 = arith.constant 0 : index
    %c0_15 = arith.constant 0 : index
    %18 = vector.load %arg9[%c0_14, %c0_15] : memref<8x128xf32, #tpu.memory_space<vmem>>, vector<8x128xf32>
    tpu.vector_store %arg9[%c0_14, %c0_15], %17 {strides = array<i32>} : memref<8x128xf32, #tpu.memory_space<vmem>>, vector<8x128xf32>,
    %c0_16 = arith.constant 0 : index
    %c0_17 = arith.constant 0 : index
    %19 = vector.load %arg6[%c0_16, %c0_17] : memref<128x128xbf16, #tpu.memory_space<vmem>>, vector<128x128xbf16>
    %c0_18 = arith.constant 0 : index
    %c0_19 = arith.constant 0 : index
    %20 = vector.load %arg7[%c0_18, %c0_19] : memref<1x128xf32, #tpu.memory_space<vmem>>, vector<1x128xf32>
    %21 = arith.truncf %17 : vector<8x128xf32> to vector<8x128xbf16>
    %cst_20 = arith.constant dense<0.000000e+00> : vector<8x128xf32>
    %22 = tpu.matmul %21, %19, %cst_20 {dimension_numbers = #tpu.dot_dimension_numbers<[1], [0], [0], [1], [0, 0, 1, 1], [], []>} : vector<8x128xbf16>, vector<128x128xbf16>, vector<8x128xf32> -> vector<8x128xf32>
    %23 = vector.broadcast %20 : vector<1x128xf32> to vector<8x128xf32>
    %24 = arith.addf %22, %23 : vector<8x128xf32>
    %c0_21 = arith.constant 0 : index
    %c0_22 = arith.constant 0 : index
    %25 = vector.load %arg10[%c0_21, %c0_22] : memref<8x128xf32, #tpu.memory_space<vmem>>, vector<8x128xf32>
    tpu.vector_store %arg10[%c0_21, %c0_22], %24 {strides = array<i32>} : memref<8x128xf32, #tpu.memory_space<vmem>>, vector<8x128xf32>,
    %26 = tpu.iota {dimensions = array<i32: 1>} : vector<8x128xi32>
    %c10_i32 = arith.constant 10 : i32
    %27 = vector.broadcast %c10_i32 : i32 to vector<8x128xi32>
    %28 = arith.cmpi slt, %26, %27 : vector<8x128xi32>
    %cst_23 = arith.constant -1.000000e+30 : f32
    %29 = vector.broadcast %cst_23 : f32 to vector<8x128xf32>
    %30 = arith.select %28, %24, %29 : vector<8x128xi1>, vector<8x128xf32>
    %cst_24 = arith.constant dense<0xFF800000> : vector<8xf32>
    %31 = vector.multi_reduction <maximumf>, %30, %cst_24 [1] : vector<8x128xf32> to vector<8xf32>
    %32 = vector.shape_cast %31 : vector<8xf32> to vector<8x1xf32>
    %33 = vector.broadcast %32 : vector<8x1xf32> to vector<8x128xf32>
    %34 = arith.subf %30, %33 : vector<8x128xf32>
    %35 = math.exp %34 : vector<8x128xf32>
    %cst_25 = arith.constant dense<0.000000e+00> : vector<8xf32>
    %36 = vector.multi_reduction <add>, %35, %cst_25 [1] : vector<8x128xf32> to vector<8xf32>
    %37 = vector.shape_cast %36 : vector<8xf32> to vector<8x1xf32>
    %38 = math.log %37 : vector<8x1xf32>
    %39 = vector.broadcast %38 : vector<8x1xf32> to vector<8x128xf32>
    %40 = arith.subf %34, %39 : vector<8x128xf32>
    %c0_26 = arith.constant 0 : index
    %c0_27 = arith.constant 0 : index
    %41 = vector.load %arg11[%c0_26, %c0_27] : memref<8x128xf32, #tpu.memory_space<vmem>>, vector<8x128xf32>
    tpu.vector_store %arg11[%c0_26, %c0_27], %40 {strides = array<i32>} : memref<8x128xf32, #tpu.memory_space<vmem>>, vector<8x128xf32>,
    return
  }
  func.func @transform_0(%arg0: i32) -> (i32, i32) {
    %c0_i32 = arith.constant 0 : i32
    %c0_i32_0 = arith.constant 0 : i32
    return %arg0, %c0_i32 : i32, i32
  }
  func.func @transform_1(%arg0: i32) -> (i32, i32) {
    %c0_i32 = arith.constant 0 : i32
    %c0_i32_0 = arith.constant 0 : i32
    %c0_i32_1 = arith.constant 0 : i32
    return %c0_i32, %c0_i32_0 : i32, i32
  }
  func.func @transform_2(%arg0: i32) -> (i32, i32) {
    %c0_i32 = arith.constant 0 : i32
    %c0_i32_0 = arith.constant 0 : i32
    %c0_i32_1 = arith.constant 0 : i32
    return %c0_i32, %c0_i32_0 : i32, i32
  }
  func.func @transform_3(%arg0: i32) -> (i32, i32) {
    %c0_i32 = arith.constant 0 : i32
    %c0_i32_0 = arith.constant 0 : i32
    %c0_i32_1 = arith.constant 0 : i32
    return %c0_i32, %c0_i32_0 : i32, i32
  }
  func.func @transform_4(%arg0: i32) -> (i32, i32) {
    %c0_i32 = arith.constant 0 : i32
    %c0_i32_0 = arith.constant 0 : i32
    %c0_i32_1 = arith.constant 0 : i32
    return %c0_i32, %c0_i32_0 : i32, i32
  }
  func.func @transform_5(%arg0: i32) -> (i32, i32) {
    %c0_i32 = arith.constant 0 : i32
    %c0_i32_0 = arith.constant 0 : i32
    %c0_i32_1 = arith.constant 0 : i32
    return %c0_i32, %c0_i32_0 : i32, i32
  }
  func.func @transform_6(%arg0: i32) -> (i32, i32) {
    %c0_i32 = arith.constant 0 : i32
    %c0_i32_0 = arith.constant 0 : i32
    %c0_i32_1 = arith.constant 0 : i32
    return %c0_i32, %c0_i32_0 : i32, i32
  }
  func.func @transform_7(%arg0: i32) -> (i32, i32) {
    %c0_i32 = arith.constant 0 : i32
    %c0_i32_0 = arith.constant 0 : i32
    return %arg0, %c0_i32 : i32, i32
  }
  func.func @transform_8(%arg0: i32) -> (i32, i32) {
    %c0_i32 = arith.constant 0 : i32
    %c0_i32_0 = arith.constant 0 : i32
    return %arg0, %c0_i32 : i32, i32
  }
  func.func @transform_9(%arg0: i32) -> (i32, i32) {
    %c0_i32 = arith.constant 0 : i32
    %c0_i32_0 = arith.constant 0 : i32
    return %arg0, %c0_i32 : i32, i32
  }
  func.func @transform_10(%arg0: i32) -> (i32, i32) {
    %c0_i32 = arith.constant 0 : i32
    %c0_i32_0 = arith.constant 0 : i32
    return %arg0, %c0_i32 : i32, i32
  }
}

</mosaic_0001>

<bundles_post_ra>
// kernel: forward.1
= control target key start
LH: loop header
LB: loop body
LE: loop exit
PB: predicated region body
PF: predicated region fallthrough
CT: control target
= control target key end

     0   :  { %16 = vsyncpa [#allocation3], 0  ;;  %s765_s0 = inlined_call_operand.vmem [shape: f32[8,256], index: 0, kind: input, shape index: {}]   ;;  %s766_s1 = inlined_call_operand.hbm [shape: bf16[256,128], index: 1, kind: input, shape index: {}]   ;;  %s767_s2 = inlined_call_operand.vmem [shape: f32[1,128], index: 2, kind: input, shape index: {}]   ;;  %s768_s3 = inlined_call_operand.hbm [shape: bf16[128,128], index: 3, kind: input, shape index: {}]   ;;  %s769_s4 = inlined_call_operand.vmem [shape: f32[1,128], index: 4, kind: input, shape index: {}]   ;;  %s770_s5 = inlined_call_operand.vmem [shape: bf16[128,128], index: 5, kind: input, shape index: {}]   ;;  %s771_s6 = inlined_call_operand.vmem [shape: f32[1,128], index: 6, kind: input, shape index: {}]   ;;  %s772_s7 = inlined_call_operand.vmem [shape: f32[8,128], index: 7, kind: output, shape index: {0}]   ;;  %s773_s8 = inlined_call_operand.vmem [shape: f32[8,128], index: 8, kind: output, shape index: {1}]   ;;  %s774_s9 = inlined_call_operand.vmem [shape: f32[8,128], index: 9, kind: output, shape index: {2}]   ;;  %s775_s10 = inlined_call_operand.vmem [shape: f32[8,128], index: 10, kind: output, shape index: {3}]  }
   0x1   :  { %s24_s15 = sshll.u32 %s766_s1, 4  ;;  %s25_s15 = int_to_ptr.hbm [resolvable:$true] %s24_s15 }
   0x2   :  { %17 = vsyncpa [#allocation5], 0  ;;  %s649_s16 = smov [#allocation2]   ;;  %s39_s20 = sshll.u32 %s768_s3, 4  ;;  %s40_s20 = int_to_ptr.hbm [resolvable:$true] %s39_s20 }
   0x3   :  { %s26_s17 = sshll.u32 %s649_s16, 4  ;;  %s650_s21 = smov 64   ;;  %s27_s17 = int_to_ptr.vmem [resolvable:$true] %s26_s17 }
   0x4   :  { %s651_s22 = smov 4   ;;  %s652_s23 = smov [#allocation4]  }
   0x5   :  { %32 = dma.hbm_to_vmem [thread:$0]  %s25_s15, 2048, %s27_s17, [#allocation3], %s650_s21, %s650_s21, %s651_s22  }
   0x6   :  { %s41_s24 = sshll.u32 %s652_s23, 4  ;;  %s42_s24 = int_to_ptr.vmem [resolvable:$true] %s41_s24 }
   0x7   :  { %47 = dma.hbm_to_vmem [thread:$0]  %s40_s20, 1024, %s42_s24, [#allocation5], %s650_s21, %s650_s21, %s651_s22  }
   0x8   :  { %645 = dma.done.wait [#allocation3], 2048  }
   0x9   :  { %646 = vsyncadd [#allocation3], 4294965248 }
   0xa   :  { %647 = dma.done.wait [#allocation5], 1024  }
   0xb   :  { %648 = vsyncadd [#allocation5], 4294966272  ;;  %v561_v0 = vld [vmem:[#allocation2 + $0x38] sm:$0xff]  ;;  %v560_v2 = vld [vmem:[#allocation2 + $0x30] sm:$0xff]  ;;  %v393_v51 = vlaneseq }
   0xc   :  { %v569_v1 = vld [vmem:[#allocation2 + $0x78] sm:$0xff]  ;;  %198 = vmatpush.bf16.msra.mxu0 %v561_v0  ;;  %v568_v3 = vld [vmem:[#allocation2 + $0x70] sm:$0xff]  ;;  %v559_v4 = vld [vmem:[#allocation2 + $0x28] sm:$0xff] }
   0xd   :  { %211 = vmatpush.bf16.msra.mxu1 %v569_v1  ;;  %v567_v5 = vld [vmem:[#allocation2 + $0x68] sm:$0xff]  ;;  %v577_v6 = vld [vmem:[#allocation4 + $0x38] sm:$0xff]  ;;  %v576_v7 = vld [vmem:[#allocation4 + $0x30] sm:$0xff]  ;;  %v394_v52 = vand.u32 127, %v393_v51 }
   0xe   :  { %295 = vmatpush.bf16.msra.mxu2 %v577_v6  ;;  %v558_v8 = vld [vmem:[#allocation2 + $0x20] sm:$0xff]  ;;  %v575_v10 = vld [vmem:[#allocation4 + $0x28] sm:$0xff]  ;;  %v557_v11 = vld [vmem:[#allocation2 + $0x18] sm:$0xff] }
   0xf   :  { %v566_v9 = vld [vmem:[#allocation2 + $0x60] sm:$0xff]  ;;  %v565_v12 = vld [vmem:[#allocation2 + $0x58] sm:$0xff]  ;;  %v556_v14 = vld [vmem:[#allocation2 + $0x10] sm:$0xff]  ;;  %vm395_vm0 = vcmp.lt.s32.totalorder %v394_v52, 10 }
  0x10   :  { %199 = vmatpush.bf16.msra.mxu0 %v560_v2  ;;  %v574_v13 = vld [vmem:[#allocation4 + $0x20] sm:$0xff]  ;;  %v564_v15 = vld [vmem:[#allocation2 + $0x50] sm:$0xff]  ;;  %v573_v16 = vld [vmem:[#allocation4 + $0x18] sm:$0xff] }
  0x11   :  { %212 = vmatpush.bf16.msra.mxu1 %v568_v3  ;;  %v555_v17 = vld [vmem:[#allocation2 + $0x8] sm:$0xff]  ;;  %v572_v19 = vld [vmem:[#allocation4 + $0x10] sm:$0xff]  ;;  %v554_v20 = vld [vmem:[#allocation2] sm:$0xff] }
  0x12   :  { %296 = vmatpush.bf16.msra.mxu2 %v576_v7  ;;  %v563_v18 = vld [vmem:[#allocation2 + $0x48] sm:$0xff]  ;;  %v562_v21 = vld [vmem:[#allocation2 + $0x40] sm:$0xff]  ;;  %v585_v28 = vld [vmem:[%s770_s5 + $0x38] sm:$0xff] }
  0x13   :  { %v62_v22 = vld [vmem:[%s765_s0] sm:$0xff]  ;;  %v63_v23 = vld [vmem:[%s765_s0 + $0x8] sm:$0xff]  ;;  %379 = vmatpush.bf16.msra.mxu3 %v585_v28  ;;  %v584_v29 = vld [vmem:[%s770_s5 + $0x30] sm:$0xff] }
  0x14   :  { %200 = vmatpush.bf16.msra.mxu0 %v559_v4  ;;  %v97_v24 = vpack.c.bf16 %v62_v22, %v62_v22  ;;  %v98_v25 = vpack.c.bf16 %v63_v23, %v63_v23  ;;  %v571_v26 = vld [vmem:[#allocation4 + $0x8] sm:$0xff]  ;;  %v570_v27 = vld [vmem:[#allocation4] sm:$0xff]  ;;  %v581_v32 = vld [vmem:[%s770_s5 + $0x18] sm:$0xff] }
  0x15   :  { %213 = vmatpush.bf16.msra.mxu1 %v567_v5  ;;  %v583_v30 = vld [vmem:[%s770_s5 + $0x28] sm:$0xff]  ;;  %v582_v31 = vld [vmem:[%s770_s5 + $0x20] sm:$0xff]  ;;  %v580_v33 = vld [vmem:[%s770_s5 + $0x10] sm:$0xff] }
  0x16   :  { %297 = vmatpush.bf16.msra.mxu2 %v575_v10  ;;  %v590_v34 = vld [vmem:[%s767_s2] ss:$0 sm:$0xff]  ;;  %v579_v43 = vld [vmem:[%s770_s5 + $0x8] sm:$0xff] }
  0x17   :  { %380 = vmatpush.bf16.msra.mxu3 %v584_v29  ;;  %v578_v44 = vld [vmem:[%s770_s5] sm:$0xff] }
  0x18   :  { %201 = vmatpush.bf16.msra.mxu0 %v558_v8  ;;  %v591_v45 = vld [vmem:[%s769_s4] ss:$0 sm:$0xff] }
  0x19   :  { %214 = vmatpush.bf16.msra.mxu1 %v566_v9  ;;  %v592_v53 = vld [vmem:[%s771_s6] ss:$0 sm:$0xff] }
  0x1a   :  { %298 = vmatpush.bf16.msra.mxu2 %v574_v13 }
  0x1b   :  { %381 = vmatpush.bf16.msra.mxu3 %v583_v30 }
  0x1c   :  { %202 = vmatpush.bf16.msra.mxu0 %v557_v11 }
  0x1d   :  { %215 = vmatpush.bf16.msra.mxu1 %v565_v12 }
  0x1e   :  { %299 = vmatpush.bf16.msra.mxu2 %v573_v16 }
  0x1f   :  { %382 = vmatpush.bf16.msra.mxu3 %v582_v31 }
  0x20   :  { %203 = vmatpush.bf16.msra.mxu0 %v556_v14 }
  0x21   :  { %216 = vmatpush.bf16.msra.mxu1 %v564_v15 }
  0x22   :  { %300 = vmatpush.bf16.msra.mxu2 %v572_v19 }
  0x23   :  { %383 = vmatpush.bf16.msra.mxu3 %v581_v32 }
  0x24   :  { %204 = vmatpush.bf16.msra.mxu0 %v555_v17 }
  0x25   :  { %217 = vmatpush.bf16.msra.mxu1 %v563_v18 }
  0x26   :  { %301 = vmatpush.bf16.msra.mxu2 %v571_v26 }
  0x27   :  { %384 = vmatpush.bf16.msra.mxu3 %v580_v33 }
  0x28   :  { %205 = vmatpush.bf16.msra.mxu0 %v554_v20 }
  0x29   :  { %218 = vmatpush.bf16.msra.mxu1 %v562_v21 }
  0x2a   :  { %302 = vmatpush.bf16.msra.mxu2 %v570_v27 }
  0x2b   :  { %206 = vmatmul.bf16.vlgmr.msra.gmra.mxu0 %v97_v24  ;;  %385 = vmatpush.bf16.msra.mxu3 %v579_v43 }
  0x2c   :  { %219 = vmatmul.bf16.vlgmr.msra.gmra.mxu1 %v98_v25 }
  0x2f   :  { %386 = vmatpush.bf16.msra.mxu3 %v578_v44 }
  0xa8   :  { %v207_v35 = vpop.f32.mrf.mxu0 }
  0xa9   :  { %v220_v36 = vpop.f32.mrf.mxu1  ;;  %v208_v37 = vadd.f32 %v590_v34, %v207_v35 }
  0xab   :  { %v221_v38 = vadd.f32 %v220_v36, %v208_v37 }
  0xad   :  { %v224_v39 = vmax.f32 %v221_v38, 0.0 }
  0xaf   :  { %225 = vst [vmem:[%s772_s7] sm:$0xff] %v224_v39  ;;  %v243_v40 = vpack.c.bf16 %v224_v39, %v224_v39 }
  0xb0   :  { %v209_v41 = vpop.f32.mrf.mxu0 }
  0xb1   :  { %v222_v42 = vpop.f32.mrf.mxu1  ;;  %303 = vmatmul.bf16.vlgmr.msra.gmra.mxu2 %v243_v40 }
 0x134   :  { %v304_v46 = vpop.f32.mrf.mxu2 }
 0x135   :  { %v305_v47 = vadd.f32 %v591_v45, %v304_v46 }
 0x137   :  { %v308_v48 = vmax.f32 %v305_v47, 0.0 }
 0x139   :  { %309 = vst [vmem:[%s773_s8] sm:$0xff] %v308_v48  ;;  %v327_v49 = vpack.c.bf16 %v308_v48, %v308_v48 }
 0x13b   :  { %387 = vmatmul.bf16.vlgmr.msra.gmra.mxu3 %v327_v49 }
 0x13c   :  { %v306_v50 = vpop.f32.mrf.mxu2 }
 0x1be   :  { %v388_v54 = vpop.f32.mrf.mxu3 }
 0x1bf   :  { %v389_v55 = vadd.f32 %v592_v53, %v388_v54 }
 0x1c1   :  { %392 = vst [vmem:[%s774_s9] sm:$0xff] %v389_v55  ;;  %v396_v56 = vsel %vm395_vm0, %v389_v55, -1e+30 }
 0x1c2   :  { %397 = vmax.xlane.f32.xlu0 %v396_v56 }
 0x1c6   :  { %v390_v57 = vpop.f32.mrf.mxu3 }
 0x235   :  { %v398_v58 = vpop.xlane.xlu0 %397 }
 0x236   :  { %v399_v59 = vsub.f32 %v396_v56, %v398_v58 }
 0x238   :  { %v400_v60 = vmul.f32 1.442695, %v399_v59 }
 0x23a   :  { %593 = vpow2.f32 %v400_v60 }
 0x240   :  { %v594_v61 = vpop.eup %593 }
 0x241   :  { %402 = vadd.xlane.f32.xlu0 %v594_v61 }
 0x2b4   :  { %v403_v62 = vpop.xlane.xlu0 %402 }
 0x2b5   :  { %595 = vlog2.f32 %v403_v62 }
 0x2bb   :  { %v596_v63 = vpop.eup %595 }
 0x2bc   :  { %v405_v0 = vmul.f32 0.6931472, %v596_v63 }
 0x2be   :  { %v406_v1 = vsub.f32 %v399_v59, %v405_v0 }
 0x2c0   :  { %407 = vst [vmem:[%s775_s10] sm:$0xff] %v406_v1 }
 0x2c1   :  { %424 = vsyncpa [#allocation3], 1 }
 0x2c2   :  { %425 = vsyncpa [#allocation5], 1 }

</bundles_post_ra>
